<compile_context>
chip_gen: v7x
topology: tpu7x:2x2x1
jax: 0.10.0
libtpu: 0.0.40
codegen_flags: <defaults>
</compile_context>

<pallas_src>
import jax
import jax.numpy as jnp
from jax.experimental import pallas as pl
from jax.experimental.pallas import tpu as pltpu

NEG_SLOPE = 0.01   # torch.nn.LeakyReLU default negative_slope
TILE_N = 512       # row-tile cap; sweep {512,1024} on v6e, keep <=512 on v7x
LANE = 128


def _round_up(x, m):
    return (x + m - 1) // m * m


def _pad2d(a, rows, cols):
    r, c = a.shape
    return jnp.pad(a, ((0, rows - r), (0, cols - c)))


# ------------------------------- Fused kernel ------------------------------- #

def _make_fused_kernel(proj_flags, out_pads):
    """Kernel closure for a fixed, static layer configuration.

    proj_flags[i] : True  -> layer i's weight ref holds [W_i | W_res_i]
                    False -> identity residual; weight ref holds W_i only.
    out_pads[i]   : lane-padded output width of hidden layer i (multiple of 128).
    """
    n_layers = len(proj_flags)

    def kernel(*refs):
        # refs: x, (w_0, b_0), ..., (w_{L-1}, b_{L-1}), w_out, b_out, o
        x_ref = refs[0]
        o_ref = refs[-1]
        layer_refs = refs[1:1 + 2 * n_layers]
        w_out_ref = refs[1 + 2 * n_layers]
        b_out_ref = refs[2 + 2 * n_layers]

        # Activation stays resident in VMEM/vregs for the whole network (f32).
        fea = x_ref[...].astype(jnp.float32)

        for i in range(n_layers):                 # static Python loop
            w_ref = layer_refs[2 * i]
            b_ref = layer_refs[2 * i + 1]
            d_out = out_pads[i]

            # One bf16 MXU matmul per layer; for projected-residual layers the
            # weight is [W | W_res] (each half 128-aligned), so a single wider
            # matmul covers both paths and the split is a free vreg-boundary slice.
            h_full = jnp.dot(fea.astype(jnp.bfloat16), w_ref[...],
                             preferred_element_type=jnp.float32)

            if proj_flags[i]:
                h = h_full[:, :d_out] + b_ref[...]   # bias only on the main path
                r = h_full[:, d_out:]                # bias-free residual projection
            else:
                h = h_full + b_ref[...]
                r = fea                              # identity residual
                if r.shape[1] < d_out:               # only possible on layer 0
                    r = jnp.concatenate(
                        [r, jnp.zeros((r.shape[0], d_out - r.shape[1]), r.dtype)],
                        axis=1)

            h = jnp.where(h > 0, h, NEG_SLOPE * h)   # LeakyReLU (VPU, f32)
            fea = h + r

        y = jnp.dot(fea.astype(jnp.bfloat16), w_out_ref[...],
                    preferred_element_type=jnp.float32)
        y = y + b_out_ref[...]
        o_ref[...] = y.astype(o_ref.dtype)

    return kernel


# --------------------------- Parameter construction ------------------------- #

def init_params(key, input_dim, output_dim, hidden_layer_dims, dtype=jnp.float32):
    """Deterministic synthetic parameters matching the torch module's shapes."""
    dims = [input_dim] + list(hidden_layer_dims)
    params = {"fcs": [], "res_fcs": [], "fc_out": None}
    for i in range(len(dims) - 1):
        d_in, d_out = dims[i], dims[i + 1]
        key, kw, kb, kr = jax.random.split(key, 4)
        scale = 1.0 / jnp.sqrt(jnp.asarray(d_in, dtype))
        w = jax.random.uniform(kw, (d_in, d_out), dtype, -scale, scale)
        b = jax.random.uniform(kb, (1, d_out), dtype, -scale, scale)
        params["fcs"].append((w, b))
        if d_in != d_out:
            w_res = jax.random.uniform(kr, (d_in, d_out), dtype, -scale, scale)
            params["res_fcs"].append(w_res)
        else:
            params["res_fcs"].append(None)  # nn.Identity()
    d_last = dims[-1]
    key, kw, kb = jax.random.split(key, 3)
    scale = 1.0 / jnp.sqrt(jnp.asarray(d_last, dtype))
    w_out = jax.random.uniform(kw, (d_last, output_dim), dtype, -scale, scale)
    b_out = jax.random.uniform(kb, (1, output_dim), dtype, -scale, scale)
    params["fc_out"] = (w_out, b_out)
    return params


def prepare_fused_params(params, weight_dtype=jnp.bfloat16):
    """One-time prep: lane-pad (128) all layer widths, concat [W | W_res] for
    projected layers, cast weights to bf16.  Padded lanes are exact zeros, so
    they never change results; biases stay f32."""
    layers, proj_flags, out_pads = [], [], []
    prev_width = (params["fcs"][0][0].shape[0] if params["fcs"]
                  else params["fc_out"][0].shape[0])
    for (w, b), w_res in zip(params["fcs"], params["res_fcs"]):
        d_out = w.shape[1]
        d_out_pad = _round_up(d_out, LANE)
        w_p = _pad2d(w, prev_width, d_out_pad)
        b_p = _pad2d(b, 1, d_out_pad).astype(jnp.float32)
        if w_res is None:
            proj_flags.append(False)
            w_cat = w_p
        else:
            proj_flags.append(True)
            wr_p = _pad2d(w_res, prev_width, d_out_pad)
            w_cat = jnp.concatenate([w_p, wr_p], axis=1)   # split lands on 128 lane
        layers.append((w_cat.astype(weight_dtype), b_p))
        out_pads.append(d_out_pad)
        prev_width = d_out_pad

    w_out, b_out = params["fc_out"]
    out_dim = w_out.shape[1]
    out_pad = _round_up(out_dim, LANE)
    w_out_p = _pad2d(w_out, prev_width, out_pad).astype(weight_dtype)
    b_out_p = _pad2d(b_out, 1, out_pad).astype(jnp.float32)
    return {
        "layers": layers,                  # list of (bf16 [W|Wres] or W, f32 b)
        "fc_out": (w_out_p, b_out_p),
        "proj_flags": tuple(proj_flags),   # static
        "out_pads": tuple(out_pads),       # static (lane-padded)
        "out_dim": out_dim,
        "out_pad": out_pad,
    }


# ------------------------------ Forward passes ------------------------------ #

def residual_network_pallas(fused, fea, tile_n=TILE_N, single_buffer_weights=True):
    """Single fused pallas_call for the whole network."""
    n, d_in = fea.shape
    w_out, b_out = fused["fc_out"]
    out_dim, out_pad = fused["out_dim"], fused["out_pad"]
    in_dtype = fea.dtype

    # Row tiling: no host-side padding; Pallas clips the partial last block.
    # For batch > 8, guarantee >= 2 grid programs so v7x can use both TCs.
    if n <= 8:
        tile = n
    else:
        tile = max(8, min(tile_n, _round_up(pl.cdiv(n, 2), 8)))
    grid = (pl.cdiv(n, tile),)

    def _const_spec(arr):
        # Weights/biases never change across grid steps; single-buffer them.
        if single_buffer_weights:
            try:
                return pl.BlockSpec(arr.shape, lambda i: (0, 0),
                                    pipeline_mode=pl.Buffered(1))
            except TypeError:
                pass
        return pl.BlockSpec(arr.shape, lambda i: (0, 0))

    # Inputs: x, then per-layer (w, b), then (w_out, b_out).
    flat_inputs = [fea]
    in_specs = [pl.BlockSpec((tile, d_in), lambda i: (i, 0))]
    for w, b in fused["layers"]:
        flat_inputs += [w, b]
        in_specs += [_const_spec(w), _const_spec(b)]
    flat_inputs += [w_out, b_out]
    in_specs += [_const_spec(w_out), _const_spec(b_out)]
    out_spec = pl.BlockSpec((tile, out_pad), lambda i: (i, 0))   # lane-dense store

    # Advisory cost estimate + explicit VMEM limit.
    flops = 0
    weight_bytes = 0
    for w, b in list(fused["layers"]) + [fused["fc_out"]]:
        flops += 2 * n * w.shape[0] * w.shape[1]
        weight_bytes += int(w.size) * w.dtype.itemsize + int(b.size) * b.dtype.itemsize
    bytes_accessed = (weight_bytes
                      + int(fea.size) * fea.dtype.itemsize
                      + n * out_pad * jnp.dtype(in_dtype).itemsize)

    widths = [d_in] + [w.shape[1] for w, _ in fused["layers"]] + [out_pad]
    w_buf = 1 if single_buffer_weights else 2
    est = (w_buf * weight_bytes
           + 2 * tile * (d_in + out_pad) * 4
           + 8 * tile * max(widths) * 4)
    vmem_limit = int(max(32 << 20, min(64 << 20, 2 * est)))

    kernel = _make_fused_kernel(fused["proj_flags"], fused["out_pads"])

    out = pl.pallas_call(
        kernel,
        out_shape=jax.ShapeDtypeStruct((n, out_pad), in_dtype),
        grid=grid,
        in_specs=in_specs,
        out_specs=out_spec,
        compiler_params=pltpu.CompilerParams(
            dimension_semantics=("parallel",),    # shard rows across TCs on v7x
            vmem_limit_bytes=vmem_limit,
        ),
        cost_estimate=pl.CostEstimate(
            flops=int(flops), transcendentals=0,
            bytes_accessed=int(bytes_accessed)),
    )(*flat_inputs)

    return out[:, :out_dim]    # drop the zero lane-padding columns


def residual_network_ref(params, fea):
    """Plain-JAX f32 reference mirroring the torch forward."""
    for (w, b), w_res in zip(params["fcs"], params["res_fcs"]):
        h = fea @ w + b
        h = jnp.where(h > 0, h, NEG_SLOPE * h)
        r = fea if w_res is None else fea @ w_res
        fea = h + r
    w_out, b_out = params["fc_out"]
    return fea @ w_out + b_out


def residual_network_ref_bf16(params, fea):
    """Plain-JAX reference using the same bf16-operand / f32-accumulate math."""
    fea = fea.astype(jnp.float32)
    for (w, b), w_res in zip(params["fcs"], params["res_fcs"]):
        h = jnp.dot(fea.astype(jnp.bfloat16), w.astype(jnp.bfloat16),
                    preferred_element_type=jnp.float32) + b
        h = jnp.where(h > 0, h, NEG_SLOPE * h)
        if w_res is None:
            r = fea
        else:
            r = jnp.dot(fea.astype(jnp.bfloat16), w_res.astype(jnp.bfloat16),
                        preferred_element_type=jnp.float32)
        fea = h + r
    w_out, b_out = params["fc_out"]
    return jnp.dot(fea.astype(jnp.bfloat16), w_out.astype(jnp.bfloat16),
                   preferred_element_type=jnp.float32) + b_out


# ----------------------------------- Main ----------------------------------- #

if __name__ == "__main__":
    key = jax.random.PRNGKey(0)

    # Small shapes consistent with the module: fea is [batch, input_dim].
    batch = 8
    input_dim = 32
    hidden_layer_dims = [64, 64, 32]   # exercises projected and identity residuals
    output_dim = 16

    key, k_params, k_x = jax.random.split(key, 3)
    params = init_params(k_params, input_dim, output_dim, hidden_layer_dims)
    fused = prepare_fused_params(params)
    x = jax.random.normal(k_x, (batch, input_dim), jnp.float32)

    try:
        out = residual_network_pallas(fused, x)
    except Exception:
        # Fallback for JAX versions without BlockSpec pipeline_mode support.
        out = residual_network_pallas(fused, x, single_buffer_weights=False)
    out = jax.block_until_ready(out)

    ref_bf16 = jax.block_until_ready(residual_network_ref_bf16(params, x))
    ref_f32 = jax.block_until_ready(residual_network_ref(params, x))

    assert out.shape == (batch, output_dim), out.shape
    # Kernel exactness vs a reference using identical bf16-operand math.
    assert jnp.allclose(out, ref_bf16, atol=1e-2, rtol=1e-2), (
        float(jnp.max(jnp.abs(out - ref_bf16))))
    # Semantic sanity vs the full-f32 torch-equivalent forward.
    assert jnp.allclose(out, ref_f32, atol=1.5e-1, rtol=1.5e-1), (
        float(jnp.max(jnp.abs(out - ref_f32))))
    print("KERNEL_OK")
</pallas_src>

<mosaic_0001>
module attributes {stable_mosaic.version = 11 : i64} {
  func.func @kernel(%arg0: i32, %arg1: memref<8x32xf32, #tpu.memory_space<vmem>>, %arg2: memref<32x256xbf16, #tpu.memory_space<vmem>>, %arg3: memref<1x128xf32, #tpu.memory_space<vmem>>, %arg4: memref<128x128xbf16, #tpu.memory_space<vmem>>, %arg5: memref<1x128xf32, #tpu.memory_space<vmem>>, %arg6: memref<128x256xbf16, #tpu.memory_space<vmem>>, %arg7: memref<1x128xf32, #tpu.memory_space<vmem>>, %arg8: memref<128x128xbf16, #tpu.memory_space<vmem>>, %arg9: memref<1x128xf32, #tpu.memory_space<vmem>>, %arg10: memref<8x128xf32, #tpu.memory_space<vmem>>) attributes {dimension_semantics = [#tpu.dimension_semantics<parallel>], iteration_bounds = array<i64: 1>, scalar_prefetch = 0 : i64, scratch_operands = 0 : i64, tpu.core_type = #tpu.core_type<tc>, window_params = [{transform_indices = @transform_0, window_bounds = array<i64: 8, 32>}, {pipeline_mode = #tpu.pipeline_mode<synchronous>, transform_indices = @transform_1, window_bounds = array<i64: 32, 256>}, {pipeline_mode = #tpu.pipeline_mode<synchronous>, transform_indices = @transform_2, window_bounds = array<i64: 1, 128>}, {pipeline_mode = #tpu.pipeline_mode<synchronous>, transform_indices = @transform_3, window_bounds = array<i64: 128, 128>}, {pipeline_mode = #tpu.pipeline_mode<synchronous>, transform_indices = @transform_4, window_bounds = array<i64: 1, 128>}, {pipeline_mode = #tpu.pipeline_mode<synchronous>, transform_indices = @transform_5, window_bounds = array<i64: 128, 256>}, {pipeline_mode = #tpu.pipeline_mode<synchronous>, transform_indices = @transform_6, window_bounds = array<i64: 1, 128>}, {pipeline_mode = #tpu.pipeline_mode<synchronous>, transform_indices = @transform_7, window_bounds = array<i64: 128, 128>}, {pipeline_mode = #tpu.pipeline_mode<synchronous>, transform_indices = @transform_8, window_bounds = array<i64: 1, 128>}, {transform_indices = @transform_9, window_bounds = array<i64: 8, 128>}]} {
    %c0 = arith.constant 0 : index
    %c0_0 = arith.constant 0 : index
    %0 = vector.load %arg1[%c0, %c0_0] : memref<8x32xf32, #tpu.memory_space<vmem>>, vector<8x32xf32>
    %1 = arith.truncf %0 : vector<8x32xf32> to vector<8x32xbf16>
    %c0_1 = arith.constant 0 : index
    %c0_2 = arith.constant 0 : index
    %2 = vector.load %arg2[%c0_1, %c0_2] : memref<32x256xbf16, #tpu.memory_space<vmem>>, vector<32x256xbf16>
    %cst = arith.constant dense<0.000000e+00> : vector<8x256xf32>
    %3 = tpu.matmul %1, %2, %cst {dimension_numbers = #tpu.dot_dimension_numbers<[1], [0], [0], [1], [0, 0, 1, 1], [], []>} : vector<8x32xbf16>, vector<32x256xbf16>, vector<8x256xf32> -> vector<8x256xf32>
    %4 = vector.extract_strided_slice %3 {offsets = [0, 0], sizes = [8, 128], strides = [1, 1]} : vector<8x256xf32> to vector<8x128xf32>
    %c0_3 = arith.constant 0 : index
    %c0_4 = arith.constant 0 : index
    %5 = vector.load %arg3[%c0_3, %c0_4] : memref<1x128xf32, #tpu.memory_space<vmem>>, vector<1x128xf32>
    %6 = vector.broadcast %5 : vector<1x128xf32> to vector<8x128xf32>
    %7 = arith.addf %4, %6 : vector<8x128xf32>
    %8 = vector.extract_strided_slice %3 {offsets = [0, 128], sizes = [8, 128], strides = [1, 1]} : vector<8x256xf32> to vector<8x128xf32>
    %cst_5 = arith.constant 0.000000e+00 : f32
    %9 = vector.broadcast %cst_5 : f32 to vector<8x128xf32>
    %10 = arith.cmpf ogt, %7, %9 : vector<8x128xf32>
    %cst_6 = arith.constant 0.00999999977 : f32
    %11 = vector.broadcast %cst_6 : f32 to vector<8x128xf32>
    %12 = arith.mulf %11, %7 : vector<8x128xf32>
    %13 = arith.select %10, %7, %12 : vector<8x128xi1>, vector<8x128xf32>
    %14 = arith.addf %13, %8 : vector<8x128xf32>
    %15 = arith.truncf %14 : vector<8x128xf32> to vector<8x128xbf16>
    %c0_7 = arith.constant 0 : index
    %c0_8 = arith.constant 0 : index
    %16 = vector.load %arg4[%c0_7, %c0_8] : memref<128x128xbf16, #tpu.memory_space<vmem>>, vector<128x128xbf16>
    %cst_9 = arith.constant dense<0.000000e+00> : vector<8x128xf32>
    %17 = tpu.matmul %15, %16, %cst_9 {dimension_numbers = #tpu.dot_dimension_numbers<[1], [0], [0], [1], [0, 0, 1, 1], [], []>} : vector<8x128xbf16>, vector<128x128xbf16>, vector<8x128xf32> -> vector<8x128xf32>
    %c0_10 = arith.constant 0 : index
    %c0_11 = arith.constant 0 : index
    %18 = vector.load %arg5[%c0_10, %c0_11] : memref<1x128xf32, #tpu.memory_space<vmem>>, vector<1x128xf32>
    %19 = vector.broadcast %18 : vector<1x128xf32> to vector<8x128xf32>
    %20 = arith.addf %17, %19 : vector<8x128xf32>
    %cst_12 = arith.constant 0.000000e+00 : f32
    %21 = vector.broadcast %cst_12 : f32 to vector<8x128xf32>
    %22 = arith.cmpf ogt, %20, %21 : vector<8x128xf32>
    %cst_13 = arith.constant 0.00999999977 : f32
    %23 = vector.broadcast %cst_13 : f32 to vector<8x128xf32>
    %24 = arith.mulf %23, %20 : vector<8x128xf32>
    %25 = arith.select %22, %20, %24 : vector<8x128xi1>, vector<8x128xf32>
    %26 = arith.addf %25, %14 : vector<8x128xf32>
    %27 = arith.truncf %26 : vector<8x128xf32> to vector<8x128xbf16>
    %c0_14 = arith.constant 0 : index
    %c0_15 = arith.constant 0 : index
    %28 = vector.load %arg6[%c0_14, %c0_15] : memref<128x256xbf16, #tpu.memory_space<vmem>>, vector<128x256xbf16>
    %cst_16 = arith.constant dense<0.000000e+00> : vector<8x256xf32>
    %29 = tpu.matmul %27, %28, %cst_16 {dimension_numbers = #tpu.dot_dimension_numbers<[1], [0], [0], [1], [0, 0, 1, 1], [], []>} : vector<8x128xbf16>, vector<128x256xbf16>, vector<8x256xf32> -> vector<8x256xf32>
    %30 = vector.extract_strided_slice %29 {offsets = [0, 0], sizes = [8, 128], strides = [1, 1]} : vector<8x256xf32> to vector<8x128xf32>
    %c0_17 = arith.constant 0 : index
    %c0_18 = arith.constant 0 : index
    %31 = vector.load %arg7[%c0_17, %c0_18] : memref<1x128xf32, #tpu.memory_space<vmem>>, vector<1x128xf32>
    %32 = vector.broadcast %31 : vector<1x128xf32> to vector<8x128xf32>
    %33 = arith.addf %30, %32 : vector<8x128xf32>
    %34 = vector.extract_strided_slice %29 {offsets = [0, 128], sizes = [8, 128], strides = [1, 1]} : vector<8x256xf32> to vector<8x128xf32>
    %cst_19 = arith.constant 0.000000e+00 : f32
    %35 = vector.broadcast %cst_19 : f32 to vector<8x128xf32>
    %36 = arith.cmpf ogt, %33, %35 : vector<8x128xf32>
    %cst_20 = arith.constant 0.00999999977 : f32
    %37 = vector.broadcast %cst_20 : f32 to vector<8x128xf32>
    %38 = arith.mulf %37, %33 : vector<8x128xf32>
    %39 = arith.select %36, %33, %38 : vector<8x128xi1>, vector<8x128xf32>
    %40 = arith.addf %39, %34 : vector<8x128xf32>
    %41 = arith.truncf %40 : vector<8x128xf32> to vector<8x128xbf16>
    %c0_21 = arith.constant 0 : index
    %c0_22 = arith.constant 0 : index
    %42 = vector.load %arg8[%c0_21, %c0_22] : memref<128x128xbf16, #tpu.memory_space<vmem>>, vector<128x128xbf16>
    %cst_23 = arith.constant dense<0.000000e+00> : vector<8x128xf32>
    %43 = tpu.matmul %41, %42, %cst_23 {dimension_numbers = #tpu.dot_dimension_numbers<[1], [0], [0], [1], [0, 0, 1, 1], [], []>} : vector<8x128xbf16>, vector<128x128xbf16>, vector<8x128xf32> -> vector<8x128xf32>
    %c0_24 = arith.constant 0 : index
    %c0_25 = arith.constant 0 : index
    %44 = vector.load %arg9[%c0_24, %c0_25] : memref<1x128xf32, #tpu.memory_space<vmem>>, vector<1x128xf32>
    %45 = vector.broadcast %44 : vector<1x128xf32> to vector<8x128xf32>
    %46 = arith.addf %43, %45 : vector<8x128xf32>
    %c0_26 = arith.constant 0 : index
    %c0_27 = arith.constant 0 : index
    %47 = vector.load %arg10[%c0_26, %c0_27] : memref<8x128xf32, #tpu.memory_space<vmem>>, vector<8x128xf32>
    tpu.vector_store %arg10[%c0_26, %c0_27], %46 {strides = array<i32>} : memref<8x128xf32, #tpu.memory_space<vmem>>, vector<8x128xf32>,
    return
  }
  func.func @transform_0(%arg0: i32) -> (i32, i32) {
    %c0_i32 = arith.constant 0 : i32
    %c0_i32_0 = arith.constant 0 : i32
    return %arg0, %c0_i32 : i32, i32
  }
  func.func @transform_1(%arg0: i32) -> (i32, i32) {
    %c0_i32 = arith.constant 0 : i32
    %c0_i32_0 = arith.constant 0 : i32
    %c0_i32_1 = arith.constant 0 : i32
    return %c0_i32, %c0_i32_0 : i32, i32
  }
  func.func @transform_2(%arg0: i32) -> (i32, i32) {
    %c0_i32 = arith.constant 0 : i32
    %c0_i32_0 = arith.constant 0 : i32
    %c0_i32_1 = arith.constant 0 : i32
    return %c0_i32, %c0_i32_0 : i32, i32
  }
  func.func @transform_3(%arg0: i32) -> (i32, i32) {
    %c0_i32 = arith.constant 0 : i32
    %c0_i32_0 = arith.constant 0 : i32
    %c0_i32_1 = arith.constant 0 : i32
    return %c0_i32, %c0_i32_0 : i32, i32
  }
  func.func @transform_4(%arg0: i32) -> (i32, i32) {
    %c0_i32 = arith.constant 0 : i32
    %c0_i32_0 = arith.constant 0 : i32
    %c0_i32_1 = arith.constant 0 : i32
    return %c0_i32, %c0_i32_0 : i32, i32
  }
  func.func @transform_5(%arg0: i32) -> (i32, i32) {
    %c0_i32 = arith.constant 0 : i32
    %c0_i32_0 = arith.constant 0 : i32
    %c0_i32_1 = arith.constant 0 : i32
    return %c0_i32, %c0_i32_0 : i32, i32
  }
  func.func @transform_6(%arg0: i32) -> (i32, i32) {
    %c0_i32 = arith.constant 0 : i32
    %c0_i32_0 = arith.constant 0 : i32
    %c0_i32_1 = arith.constant 0 : i32
    return %c0_i32, %c0_i32_0 : i32, i32
  }
  func.func @transform_7(%arg0: i32) -> (i32, i32) {
    %c0_i32 = arith.constant 0 : i32
    %c0_i32_0 = arith.constant 0 : i32
    %c0_i32_1 = arith.constant 0 : i32
    return %c0_i32, %c0_i32_0 : i32, i32
  }
  func.func @transform_8(%arg0: i32) -> (i32, i32) {
    %c0_i32 = arith.constant 0 : i32
    %c0_i32_0 = arith.constant 0 : i32
    %c0_i32_1 = arith.constant 0 : i32
    return %c0_i32, %c0_i32_0 : i32, i32
  }
  func.func @transform_9(%arg0: i32) -> (i32, i32) {
    %c0_i32 = arith.constant 0 : i32
    %c0_i32_0 = arith.constant 0 : i32
    return %arg0, %c0_i32 : i32, i32
  }
}

module attributes {stable_mosaic.version = 11 : i64} {
  func.func @kernel(%arg0: i32, %arg1: memref<8x32xf32, #tpu.memory_space<vmem>>, %arg2: memref<32x256xbf16, #tpu.memory_space<vmem>>, %arg3: memref<1x128xf32, #tpu.memory_space<vmem>>, %arg4: memref<128x128xbf16, #tpu.memory_space<vmem>>, %arg5: memref<1x128xf32, #tpu.memory_space<vmem>>, %arg6: memref<128x256xbf16, #tpu.memory_space<vmem>>, %arg7: memref<1x128xf32, #tpu.memory_space<vmem>>, %arg8: memref<128x128xbf16, #tpu.memory_space<vmem>>, %arg9: memref<1x128xf32, #tpu.memory_space<vmem>>, %arg10: memref<8x128xf32, #tpu.memory_space<vmem>>) attributes {dimension_semantics = [#tpu.dimension_semantics<parallel>], iteration_bounds = array<i64: 1>, scalar_prefetch = 0 : i64, scratch_operands = 0 : i64, tpu.core_type = #tpu.core_type<tc>, window_params = [{transform_indices = @transform_0, window_bounds = array<i64: 8, 32>}, {pipeline_mode = #tpu.pipeline_mode<synchronous>, transform_indices = @transform_1, window_bounds = array<i64: 32, 256>}, {pipeline_mode = #tpu.pipeline_mode<synchronous>, transform_indices = @transform_2, window_bounds = array<i64: 1, 128>}, {pipeline_mode = #tpu.pipeline_mode<synchronous>, transform_indices = @transform_3, window_bounds = array<i64: 128, 128>}, {pipeline_mode = #tpu.pipeline_mode<synchronous>, transform_indices = @transform_4, window_bounds = array<i64: 1, 128>}, {pipeline_mode = #tpu.pipeline_mode<synchronous>, transform_indices = @transform_5, window_bounds = array<i64: 128, 256>}, {pipeline_mode = #tpu.pipeline_mode<synchronous>, transform_indices = @transform_6, window_bounds = array<i64: 1, 128>}, {pipeline_mode = #tpu.pipeline_mode<synchronous>, transform_indices = @transform_7, window_bounds = array<i64: 128, 128>}, {pipeline_mode = #tpu.pipeline_mode<synchronous>, transform_indices = @transform_8, window_bounds = array<i64: 1, 128>}, {transform_indices = @transform_9, window_bounds = array<i64: 8, 128>}]} {
    %c0 = arith.constant 0 : index
    %c0_0 = arith.constant 0 : index
    %0 = vector.load %arg1[%c0, %c0_0] : memref<8x32xf32, #tpu.memory_space<vmem>>, vector<8x32xf32>
    %1 = arith.truncf %0 : vector<8x32xf32> to vector<8x32xbf16>
    %c0_1 = arith.constant 0 : index
    %c0_2 = arith.constant 0 : index
    %2 = vector.load %arg2[%c0_1, %c0_2] : memref<32x256xbf16, #tpu.memory_space<vmem>>, vector<32x256xbf16>
    %cst = arith.constant dense<0.000000e+00> : vector<8x256xf32>
    %3 = tpu.matmul %1, %2, %cst {dimension_numbers = #tpu.dot_dimension_numbers<[1], [0], [0], [1], [0, 0, 1, 1], [], []>} : vector<8x32xbf16>, vector<32x256xbf16>, vector<8x256xf32> -> vector<8x256xf32>
    %4 = vector.extract_strided_slice %3 {offsets = [0, 0], sizes = [8, 128], strides = [1, 1]} : vector<8x256xf32> to vector<8x128xf32>
    %c0_3 = arith.constant 0 : index
    %c0_4 = arith.constant 0 : index
    %5 = vector.load %arg3[%c0_3, %c0_4] : memref<1x128xf32, #tpu.memory_space<vmem>>, vector<1x128xf32>
    %6 = vector.broadcast %5 : vector<1x128xf32> to vector<8x128xf32>
    %7 = arith.addf %4, %6 : vector<8x128xf32>
    %8 = vector.extract_strided_slice %3 {offsets = [0, 128], sizes = [8, 128], strides = [1, 1]} : vector<8x256xf32> to vector<8x128xf32>
    %cst_5 = arith.constant 0.000000e+00 : f32
    %9 = vector.broadcast %cst_5 : f32 to vector<8x128xf32>
    %10 = arith.cmpf ogt, %7, %9 : vector<8x128xf32>
    %cst_6 = arith.constant 0.00999999977 : f32
    %11 = vector.broadcast %cst_6 : f32 to vector<8x128xf32>
    %12 = arith.mulf %11, %7 : vector<8x128xf32>
    %13 = arith.select %10, %7, %12 : vector<8x128xi1>, vector<8x128xf32>
    %14 = arith.addf %13, %8 : vector<8x128xf32>
    %15 = arith.truncf %14 : vector<8x128xf32> to vector<8x128xbf16>
    %c0_7 = arith.constant 0 : index
    %c0_8 = arith.constant 0 : index
    %16 = vector.load %arg4[%c0_7, %c0_8] : memref<128x128xbf16, #tpu.memory_space<vmem>>, vector<128x128xbf16>
    %cst_9 = arith.constant dense<0.000000e+00> : vector<8x128xf32>
    %17 = tpu.matmul %15, %16, %cst_9 {dimension_numbers = #tpu.dot_dimension_numbers<[1], [0], [0], [1], [0, 0, 1, 1], [], []>} : vector<8x128xbf16>, vector<128x128xbf16>, vector<8x128xf32> -> vector<8x128xf32>
    %c0_10 = arith.constant 0 : index
    %c0_11 = arith.constant 0 : index
    %18 = vector.load %arg5[%c0_10, %c0_11] : memref<1x128xf32, #tpu.memory_space<vmem>>, vector<1x128xf32>
    %19 = vector.broadcast %18 : vector<1x128xf32> to vector<8x128xf32>
    %20 = arith.addf %17, %19 : vector<8x128xf32>
    %cst_12 = arith.constant 0.000000e+00 : f32
    %21 = vector.broadcast %cst_12 : f32 to vector<8x128xf32>
    %22 = arith.cmpf ogt, %20, %21 : vector<8x128xf32>
    %cst_13 = arith.constant 0.00999999977 : f32
    %23 = vector.broadcast %cst_13 : f32 to vector<8x128xf32>
    %24 = arith.mulf %23, %20 : vector<8x128xf32>
    %25 = arith.select %22, %20, %24 : vector<8x128xi1>, vector<8x128xf32>
    %26 = arith.addf %25, %14 : vector<8x128xf32>
    %27 = arith.truncf %26 : vector<8x128xf32> to vector<8x128xbf16>
    %c0_14 = arith.constant 0 : index
    %c0_15 = arith.constant 0 : index
    %28 = vector.load %arg6[%c0_14, %c0_15] : memref<128x256xbf16, #tpu.memory_space<vmem>>, vector<128x256xbf16>
    %cst_16 = arith.constant dense<0.000000e+00> : vector<8x256xf32>
    %29 = tpu.matmul %27, %28, %cst_16 {dimension_numbers = #tpu.dot_dimension_numbers<[1], [0], [0], [1], [0, 0, 1, 1], [], []>} : vector<8x128xbf16>, vector<128x256xbf16>, vector<8x256xf32> -> vector<8x256xf32>
    %30 = vector.extract_strided_slice %29 {offsets = [0, 0], sizes = [8, 128], strides = [1, 1]} : vector<8x256xf32> to vector<8x128xf32>
    %c0_17 = arith.constant 0 : index
    %c0_18 = arith.constant 0 : index
    %31 = vector.load %arg7[%c0_17, %c0_18] : memref<1x128xf32, #tpu.memory_space<vmem>>, vector<1x128xf32>
    %32 = vector.broadcast %31 : vector<1x128xf32> to vector<8x128xf32>
    %33 = arith.addf %30, %32 : vector<8x128xf32>
    %34 = vector.extract_strided_slice %29 {offsets = [0, 128], sizes = [8, 128], strides = [1, 1]} : vector<8x256xf32> to vector<8x128xf32>
    %cst_19 = arith.constant 0.000000e+00 : f32
    %35 = vector.broadcast %cst_19 : f32 to vector<8x128xf32>
    %36 = arith.cmpf ogt, %33, %35 : vector<8x128xf32>
    %cst_20 = arith.constant 0.00999999977 : f32
    %37 = vector.broadcast %cst_20 : f32 to vector<8x128xf32>
    %38 = arith.mulf %37, %33 : vector<8x128xf32>
    %39 = arith.select %36, %33, %38 : vector<8x128xi1>, vector<8x128xf32>
    %40 = arith.addf %39, %34 : vector<8x128xf32>
    %41 = arith.truncf %40 : vector<8x128xf32> to vector<8x128xbf16>
    %c0_21 = arith.constant 0 : index
    %c0_22 = arith.constant 0 : index
    %42 = vector.load %arg8[%c0_21, %c0_22] : memref<128x128xbf16, #tpu.memory_space<vmem>>, vector<128x128xbf16>
    %cst_23 = arith.constant dense<0.000000e+00> : vector<8x128xf32>
    %43 = tpu.matmul %41, %42, %cst_23 {dimension_numbers = #tpu.dot_dimension_numbers<[1], [0], [0], [1], [0, 0, 1, 1], [], []>} : vector<8x128xbf16>, vector<128x128xbf16>, vector<8x128xf32> -> vector<8x128xf32>
    %c0_24 = arith.constant 0 : index
    %c0_25 = arith.constant 0 : index
    %44 = vector.load %arg9[%c0_24, %c0_25] : memref<1x128xf32, #tpu.memory_space<vmem>>, vector<1x128xf32>
    %45 = vector.broadcast %44 : vector<1x128xf32> to vector<8x128xf32>
    %46 = arith.addf %43, %45 : vector<8x128xf32>
    %c0_26 = arith.constant 0 : index
    %c0_27 = arith.constant 0 : index
    %47 = vector.load %arg10[%c0_26, %c0_27] : memref<8x128xf32, #tpu.memory_space<vmem>>, vector<8x128xf32>
    tpu.vector_store %arg10[%c0_26, %c0_27], %46 {strides = array<i32>} : memref<8x128xf32, #tpu.memory_space<vmem>>, vector<8x128xf32>,
    return
  }
  func.func @transform_0(%arg0: i32) -> (i32, i32) {
    %c0_i32 = arith.constant 0 : i32
    %c0_i32_0 = arith.constant 0 : i32
    return %arg0, %c0_i32 : i32, i32
  }
  func.func @transform_1(%arg0: i32) -> (i32, i32) {
    %c0_i32 = arith.constant 0 : i32
    %c0_i32_0 = arith.constant 0 : i32
    %c0_i32_1 = arith.constant 0 : i32
    return %c0_i32, %c0_i32_0 : i32, i32
  }
  func.func @transform_2(%arg0: i32) -> (i32, i32) {
    %c0_i32 = arith.constant 0 : i32
    %c0_i32_0 = arith.constant 0 : i32
    %c0_i32_1 = arith.constant 0 : i32
    return %c0_i32, %c0_i32_0 : i32, i32
  }
  func.func @transform_3(%arg0: i32) -> (i32, i32) {
    %c0_i32 = arith.constant 0 : i32
    %c0_i32_0 = arith.constant 0 : i32
    %c0_i32_1 = arith.constant 0 : i32
    return %c0_i32, %c0_i32_0 : i32, i32
  }
  func.func @transform_4(%arg0: i32) -> (i32, i32) {
    %c0_i32 = arith.constant 0 : i32
    %c0_i32_0 = arith.constant 0 : i32
    %c0_i32_1 = arith.constant 0 : i32
    return %c0_i32, %c0_i32_0 : i32, i32
  }
  func.func @transform_5(%arg0: i32) -> (i32, i32) {
    %c0_i32 = arith.constant 0 : i32
    %c0_i32_0 = arith.constant 0 : i32
    %c0_i32_1 = arith.constant 0 : i32
    return %c0_i32, %c0_i32_0 : i32, i32
  }
  func.func @transform_6(%arg0: i32) -> (i32, i32) {
    %c0_i32 = arith.constant 0 : i32
    %c0_i32_0 = arith.constant 0 : i32
    %c0_i32_1 = arith.constant 0 : i32
    return %c0_i32, %c0_i32_0 : i32, i32
  }
  func.func @transform_7(%arg0: i32) -> (i32, i32) {
    %c0_i32 = arith.constant 0 : i32
    %c0_i32_0 = arith.constant 0 : i32
    %c0_i32_1 = arith.constant 0 : i32
    return %c0_i32, %c0_i32_0 : i32, i32
  }
  func.func @transform_8(%arg0: i32) -> (i32, i32) {
    %c0_i32 = arith.constant 0 : i32
    %c0_i32_0 = arith.constant 0 : i32
    %c0_i32_1 = arith.constant 0 : i32
    return %c0_i32, %c0_i32_0 : i32, i32
  }
  func.func @transform_9(%arg0: i32) -> (i32, i32) {
    %c0_i32 = arith.constant 0 : i32
    %c0_i32_0 = arith.constant 0 : i32
    return %arg0, %c0_i32 : i32, i32
  }
}

</mosaic_0001>

<bundles_post_ra>
// kernel: tpu_custom_call.1
= control target key start
LH: loop header
LB: loop body
LE: loop exit
PB: predicated region body
PF: predicated region fallthrough
CT: control target
= control target key end

     0   :  { %14 = vsyncpa [#allocation3], 0  ;;  %s1044_s0 = inlined_call_operand.hbm [shape: f32[8,32], index: 0, kind: input, shape index: {}]   ;;  %s1045_s1 = inlined_call_operand.hbm [shape: bf16[32,256], index: 1, kind: input, shape index: {}]   ;;  %s1046_s2 = inlined_call_operand.vmem [shape: f32[1,128], index: 2, kind: input, shape index: {}]   ;;  %s1047_s3 = inlined_call_operand.hbm [shape: bf16[128,128], index: 3, kind: input, shape index: {}]   ;;  %s1048_s4 = inlined_call_operand.vmem [shape: f32[1,128], index: 4, kind: input, shape index: {}]   ;;  %s1049_s5 = inlined_call_operand.hbm [shape: bf16[128,256], index: 5, kind: input, shape index: {}]   ;;  %s1050_s6 = inlined_call_operand.vmem [shape: f32[1,128], index: 6, kind: input, shape index: {}]   ;;  %s1051_s7 = inlined_call_operand.hbm [shape: bf16[128,128], index: 7, kind: input, shape index: {}]   ;;  %s1052_s8 = inlined_call_operand.vmem [shape: f32[1,128], index: 8, kind: input, shape index: {}]   ;;  %s1053_s9 = inlined_call_operand.hbm [shape: f32[8,128], index: 9, kind: output, shape index: {}]  }
   0x1   :  { %15 = vsyncpa [#allocation6], 0 }
   0x2   :  { %16 = vsyncpa [#allocation9], 0 }
   0x3   :  { %17 = vsyncpa [#allocation4], 0  ;;  %s877_s30 = smov [#allocation5]   ;;  %s737_s13 = scalar_lea.hbm %s1045_s1, 512 }
   0x4   :  { %s33_s10 = sshll.u32 %s877_s30, 4  ;;  %p738_p0 = scmp.ne.s32.totalorder %s1045_s1, %s737_s13  ;;  %s34_s10 = int_to_ptr.vmem [resolvable:$true] %s33_s10 }
   0x5   :  { %p741_p1 = scmp.lt.u32.totalorder %s737_s13, %s1045_s1 }
   0x7   :  { %p743_p2 = pnand %p741_p1, %p738_p0 }
   0x9   :  { %746 = shalt.err (!%p743_p2)
}
   0xa   :  { %s747_s18 = scalar_lea.vmem %s34_s10, 512  ;;  %p752_p4 = scmp.lt.s32.totalorder %s34_s10, %s34_s10 }
   0xb   :  { %p748_p3 = scmp.ne.s32.totalorder %s34_s10, %s747_s18  ;;  %p753_p5 = scmp.lt.s32.totalorder %s747_s18, %s747_s18 }
   0xd   :  { %p754_p6 = por %p753_p5, %p752_p4 }
   0xf   :  { %p755_p7 = pnand %p754_p6, %p748_p3 }
  0x11   :  { %758 = shalt.err (!%p755_p7)
}
  0x12   :  { %s878_s19 = smov 128   ;;  %s879_s20 = smov 8  }
  0x13   :  { %39 = dma.hbm_to_vmem [thread:$0]  %s1045_s1, 512, %s34_s10, [#allocation6], %s878_s19, %s878_s19, %s879_s20  }
  0x14   :  { %s880_s23 = smov [#allocation8]   ;;  %s881_s25 = smov [#allocation2]  }
  0x15   :  { %s61_s24 = sshll.u32 %s880_s23, 4  ;;  %s24_s26 = sshll.u32 %s881_s25, 4  ;;  %s62_s24 = int_to_ptr.vmem [resolvable:$true] %s61_s24  ;;  %s25_s26 = int_to_ptr.vmem [resolvable:$true] %s24_s26 }
  0x16   :  { %s759_s29 = scalar_lea.hbm %s1049_s5, 2048 }
  0x17   :  { %p760_p8 = scmp.ne.s32.totalorder %s1049_s5, %s759_s29  ;;  %p763_p9 = scmp.lt.u32.totalorder %s759_s29, %s1049_s5 }
  0x19   :  { %p765_p10 = pnand %p763_p9, %p760_p8 }
  0x1b   :  { %768 = shalt.err (!%p765_p10)
}
  0x1c   :  { %s769_s1 = scalar_lea.vmem %s62_s24, 2048  ;;  %p774_p12 = scmp.lt.s32.totalorder %s62_s24, %s62_s24 }
  0x1d   :  { %p770_p11 = scmp.ne.s32.totalorder %s62_s24, %s769_s1  ;;  %p775_p13 = scmp.lt.s32.totalorder %s769_s1, %s769_s1 }
  0x1f   :  { %p776_p0 = por %p775_p13, %p774_p12 }
  0x21   :  { %p777_p1 = pnand %p776_p0, %p770_p11 }
  0x23   :  { %780 = shalt.err (!%p777_p1)
}
  0x24   :  { %67 = dma.hbm_to_vmem [thread:$0]  %s1049_s5, 2048, %s62_s24, [#allocation9], %s878_s19, %s878_s19, %s879_s20  }
  0x25   :  { %s781_s17 = scalar_lea.hbm %s1044_s0, 128 }
  0x26   :  { %p782_p2 = scmp.ne.s32.totalorder %s1044_s0, %s781_s17  ;;  %p785_p3 = scmp.lt.u32.totalorder %s781_s17, %s1044_s0 }
  0x28   :  { %p787_p4 = pnand %p785_p3, %p782_p2 }
  0x2a   :  { %790 = shalt.err (!%p787_p4)
}
  0x2b   :  { %s791_s25 = scalar_lea.vmem %s25_s26, 128  ;;  %p796_p6 = scmp.lt.s32.totalorder %s25_s26, %s25_s26 }
  0x2c   :  { %p792_p5 = scmp.ne.s32.totalorder %s25_s26, %s791_s25  ;;  %p797_p7 = scmp.lt.s32.totalorder %s791_s25, %s791_s25 }
  0x2e   :  { %p798_p8 = por %p797_p7, %p796_p6 }
  0x30   :  { %p799_p9 = pnand %p798_p8, %p792_p5 }
  0x32   :  { %802 = shalt.err (!%p799_p9)
}
  0x33   :  { %27 = dma.hbm_to_vmem [thread:$0]  %s1044_s0, 128, %s25_s26, [#allocation3]  }
  0x34   :  { %s882_s20 = smov [#allocation7]   ;;  %s803_s29 = scalar_lea.hbm %s1047_s3, 1024 }
  0x35   :  { %s47_s24 = sshll.u32 %s882_s20, 4  ;;  %p804_p10 = scmp.ne.s32.totalorder %s1047_s3, %s803_s29  ;;  %s48_s24 = int_to_ptr.vmem [resolvable:$true] %s47_s24 }
  0x36   :  { %p807_p11 = scmp.lt.u32.totalorder %s803_s29, %s1047_s3 }
  0x38   :  { %p809_p12 = pnand %p807_p11, %p804_p10 }
  0x3a   :  { %812 = shalt.err (!%p809_p12)
}
  0x3b   :  { %s813_s1 = scalar_lea.vmem %s48_s24, 1024  ;;  %p818_p0 = scmp.lt.s32.totalorder %s48_s24, %s48_s24 }
  0x3c   :  { %p814_p13 = scmp.ne.s32.totalorder %s48_s24, %s813_s1  ;;  %p819_p1 = scmp.lt.s32.totalorder %s813_s1, %s813_s1 }
  0x3e   :  { %p820_p2 = por %p819_p1, %p818_p0 }
  0x40   :  { %p821_p3 = pnand %p820_p2, %p814_p13 }
  0x42   :  { %824 = shalt.err (!%p821_p3)
}
  0x43   :  { %s883_s0 = smov 64   ;;  %s884_s26 = smov 4  }
  0x44   :  { %53 = dma.hbm_to_vmem [thread:$0]  %s1047_s3, 1024, %s48_s24, [#allocation6], %s883_s0, %s883_s0, %s884_s26  }
  0x45   :  { %s885_s15 = smov [#allocation10]   ;;  %s825_s21 = scalar_lea.hbm %s1051_s7, 1024 }
  0x46   :  { %s75_s16 = sshll.u32 %s885_s15, 4  ;;  %p826_p4 = scmp.ne.s32.totalorder %s1051_s7, %s825_s21  ;;  %s76_s16 = int_to_ptr.vmem [resolvable:$true] %s75_s16 }
  0x47   :  { %p829_p5 = scmp.lt.u32.totalorder %s825_s21, %s1051_s7 }
  0x49   :  { %p831_p6 = pnand %p829_p5, %p826_p4 }
  0x4b   :  { %834 = shalt.err (!%p831_p6)
}
  0x4c   :  { %s835_s19 = scalar_lea.vmem %s76_s16, 1024  ;;  %p840_p8 = scmp.lt.s32.totalorder %s76_s16, %s76_s16 }
  0x4d   :  { %p836_p7 = scmp.ne.s32.totalorder %s76_s16, %s835_s19  ;;  %p841_p9 = scmp.lt.s32.totalorder %s835_s19, %s835_s19 }
  0x4f   :  { %p842_p10 = por %p841_p9, %p840_p8 }
  0x51   :  { %p843_p11 = pnand %p842_p10, %p836_p7 }
  0x53   :  { %846 = shalt.err (!%p843_p11)
}
  0x54   :  { %81 = dma.hbm_to_vmem [thread:$0]  %s1051_s7, 1024, %s76_s16, [#allocation9], %s883_s0, %s883_s0, %s884_s26  }
  0x55   :  { %869 = dma.done.wait [#allocation3], 128  }
  0x56   :  { %870 = vsyncadd [#allocation3], 4294967168 }
  0x57   :  { %871 = dma.done.wait [#allocation6], 1536  }
  0x58   :  { %872 = vsyncadd [#allocation6], 4294965760 }
  0x59   :  { %873 = dma.done.wait [#allocation9], 3072  }
  0x5a   :  { %874 = vsyncadd [#allocation9], 4294964224  ;;  %v886_v0 = vmov 0   ;;  %v887_v1 = vmov 0.0   ;;  %v691_v2 = vld [vmem:[#allocation5 + $0x4] ss:$8 sps:$4 sm:$0xff]  }
  0x5b   :  { %162 = vmatprep.mubr.bf16.mxu0 %v886_v0  ;;  %638 = vmatprep.subr.bf16.mxu1 %v887_v1  ;;  %v693_v3 = vld [vmem:[#allocation5] ss:$8 sps:$4 sm:$0xff]   ;;  %v694_v4 = vld [vmem:[#allocation5 + $0x14] ss:$8 sps:$4 sm:$0xff]   ;;  %v696_v5 = vld [vmem:[#allocation5 + $0x10] ss:$8 sps:$4 sm:$0xff]  }
  0x5c   :  { %130 = vmatprep.subr.bf16.mxu0 %v691_v2  ;;  %v100_v6 = vld [vmem:[#allocation2] sm:$0xff]  ;;  %v697_v7 = vld [vmem:[#allocation7] sm:$0xff]   ;;  %v698_v8 = vld [vmem:[#allocation7 + $0x8] sm:$0xff]   ;;  %vm126_vm0 = vcmask 261120   ;;  %vm888_vm1 = vmmov 0   ;;  %s889_s11 = smov [#allocation11]  }
  0x5d   :  { %131 = vmatpush1.bf16.msra.mxu0 %v693_v3  ;;  %639 = vmatpush3.bf16.msra.mxu1 %v697_v7  ;;  %v101_v9 = vpack.c.bf16 %v100_v6, %v100_v6  ;;  %v699_v10 = vld [vmem:[#allocation7 + $0x10] sm:$0xff]   ;;  %v700_v11 = vld [vmem:[#allocation7 + $0x18] sm:$0xff]   ;;  %v701_v12 = vld [vmem:[#allocation7 + $0x20] sm:$0xff]   ;;  %s568_s12 = sshll.u32 %s889_s11, 4  ;;  %s569_s12 = int_to_ptr.vmem [resolvable:$true] %s568_s12 }
  0x5e   :  { %132 = vmatprep.subr.bf16.mxu0 %v694_v4  ;;  %640 = vmatprep.subr.bf16.mxu1 %v887_v1  ;;  %v702_v13 = vld [vmem:[#allocation7 + $0x28] sm:$0xff]   ;;  %v703_v14 = vld [vmem:[#allocation7 + $0x30] sm:$0xff]   ;;  %v704_v15 = vld [vmem:[#allocation7 + $0x38] sm:$0xff]   ;;  %p852_p13 = scmp.lt.s32.totalorder %s569_s12, %s569_s12 }
  0x5f   :  { %654 = vmatprep.mubr.msk.bf16.mxu1 %vm888_vm1, %v887_v1  ;;  %v705_v16 = vld [vmem:[#allocation8] ss:$8 sps:$4 sm:$0xff]   ;;  %v707_v17 = vld [vmem:[#allocation8 + $0x4] ss:$8 sps:$4 sm:$0xff]   ;;  %v710_v18 = vld [vmem:[#allocation8 + $0x14] ss:$8 sps:$4 sm:$0xff]  }
  0x60   :  { %v708_v19 = vld [vmem:[#allocation8 + $0x10] ss:$8 sps:$4 sm:$0xff]   ;;  %v713_v20 = vld [vmem:[#allocation8 + $0x24] ss:$8 sps:$4 sm:$0xff]   ;;  %v711_v21 = vld [vmem:[#allocation8 + $0x20] ss:$8 sps:$4 sm:$0xff]  }
  0x61   :  { %133 = vmatpush1.bf16.msra.mxu0 %v696_v5  ;;  %641 = vmatpush3.bf16.msra.mxu1 %v698_v8  ;;  %v716_v22 = vld [vmem:[#allocation8 + $0x34] ss:$8 sps:$4 sm:$0xff]   ;;  %v714_v23 = vld [vmem:[#allocation8 + $0x30] ss:$8 sps:$4 sm:$0xff]   ;;  %v719_v24 = vld [vmem:[#allocation8 + $0x44] ss:$8 sps:$4 sm:$0xff]  }
  0x62   :  { %642 = vmatprep.subr.bf16.mxu1 %v887_v1  ;;  %396 = vmatprep.subr.bf16.mxu0 %v707_v17  ;;  %v717_v25 = vld [vmem:[#allocation8 + $0x40] ss:$8 sps:$4 sm:$0xff]   ;;  %v722_v26 = vld [vmem:[#allocation8 + $0x54] ss:$8 sps:$4 sm:$0xff]   ;;  %v720_v27 = vld [vmem:[#allocation8 + $0x50] ss:$8 sps:$4 sm:$0xff]  }
  0x63   :  { %v584_v28 = vld [vmem:[%s1046_s2] ss:$0 sm:$0xff]  ;;  %v725_v38 = vld [vmem:[#allocation8 + $0x64] ss:$8 sps:$4 sm:$0xff]   ;;  %v723_v39 = vld [vmem:[#allocation8 + $0x60] ss:$8 sps:$4 sm:$0xff]  }
  0x64   :  { %583 = vmatmul.mubr.msk.bf16.vlgmr.msra.gmra.mrb[0].mxu0 %vm126_vm0, %v101_v9  ;;  %v728_v40 = vld [vmem:[#allocation8 + $0x74] ss:$8 sps:$4 sm:$0xff]   ;;  %v726_v41 = vld [vmem:[#allocation8 + $0x70] ss:$8 sps:$4 sm:$0xff]   ;;  %v729_v42 = vld [vmem:[#allocation10] sm:$0xff]  }
  0x65   :  { %428 = vmatprep.mubr.bf16.mxu0 %v886_v0  ;;  %643 = vmatpush3.bf16.msra.mxu1 %v699_v10  ;;  %v730_v43 = vld [vmem:[#allocation10 + $0x8] sm:$0xff]   ;;  %v731_v44 = vld [vmem:[#allocation10 + $0x10] sm:$0xff]   ;;  %v732_v45 = vld [vmem:[#allocation10 + $0x18] sm:$0xff]  }
  0x66   :  { %644 = vmatprep.subr.bf16.mxu1 %v887_v1  ;;  %397 = vmatpush1.bf16.msra.mxu0 %v705_v16  ;;  %v733_v46 = vld [vmem:[#allocation10 + $0x20] sm:$0xff]   ;;  %v734_v47 = vld [vmem:[#allocation10 + $0x28] sm:$0xff]   ;;  %v585_v48 = vld [vmem:[%s1048_s4] ss:$0 sm:$0xff] }
  0x67   :  { %398 = vmatprep.subr.bf16.mxu0 %v710_v18  ;;  %v735_v58 = vld [vmem:[#allocation10 + $0x30] sm:$0xff]   ;;  %v736_v59 = vld [vmem:[#allocation10 + $0x38] sm:$0xff]  }
  0x68   :  { %v610_v60 = vld [vmem:[%s1050_s6] ss:$0 sm:$0xff]  ;;  %s847_s6 = scalar_lea.vmem %s569_s12, 128 }
  0x69   :  { %645 = vmatpush3.bf16.msra.mxu1 %v700_v11  ;;  %p848_p12 = scmp.ne.s32.totalorder %s569_s12, %s847_s6  ;;  %p853_p0 = scmp.lt.s32.totalorder %s847_s6, %s847_s6 }
  0x6a   :  { %646 = vmatprep.subr.bf16.mxu1 %v887_v1  ;;  %399 = vmatpush1.bf16.msra.mxu0 %v708_v19 }
  0x6b   :  { %400 = vmatprep.subr.bf16.mxu0 %v713_v20  ;;  %p854_p1 = por %p853_p0, %p852_p13 }
  0x6d   :  { %647 = vmatpush3.bf16.msra.mxu1 %v701_v12  ;;  %p855_p2 = pnand %p854_p1, %p848_p12 }
  0x6e   :  { %648 = vmatprep.subr.bf16.mxu1 %v887_v1  ;;  %401 = vmatpush1.bf16.msra.mxu0 %v711_v21 }
  0x6f   :  { %402 = vmatprep.subr.bf16.mxu0 %v716_v22 }
  0x71   :  { %649 = vmatpush3.bf16.msra.mxu1 %v702_v13 }
  0x72   :  { %650 = vmatprep.subr.bf16.mxu1 %v887_v1  ;;  %403 = vmatpush1.bf16.msra.mxu0 %v714_v23 }
  0x73   :  { %404 = vmatprep.subr.bf16.mxu0 %v719_v24 }
  0x75   :  { %651 = vmatpush3.bf16.msra.mxu1 %v703_v14 }
  0x76   :  { %652 = vmatprep.subr.bf16.mxu1 %v887_v1  ;;  %405 = vmatpush1.bf16.msra.mxu0 %v717_v25 }
  0x77   :  { %406 = vmatprep.subr.bf16.mxu0 %v722_v26 }
  0x79   :  { %653 = vmatpush3.bf16.msra.mxu1 %v704_v15 }
  0x7a   :  { %658 = vmatprep.subr.bf16.mxu1 %v887_v1  ;;  %407 = vmatpush1.bf16.msra.mxu0 %v720_v27 }
  0x7b   :  { %408 = vmatprep.subr.bf16.mxu0 %v725_v38 }
  0x7e   :  { %409 = vmatpush1.bf16.msra.mxu0 %v723_v39 }
  0x7f   :  { %410 = vmatprep.subr.bf16.mxu0 %v728_v40 }
  0x82   :  { %411 = vmatpush1.bf16.msra.mxu0 %v726_v41 }
 0x137   :  { %v164_v29 = vpop.f32.mrb[0].mxu0 }
 0x138   :  { %v178_v30 = vadd.f32 %v584_v28, %v164_v29  ;;  %v166_v31 = vpop.f32.mrb[1].mxu0 }
 0x139   :  { %v168_v32 = vpop.f32.mrb[2].mxu0 }
 0x13a   :  { %v180_v33 = vmul.f32 0.01, %v178_v30  ;;  %vm179_vm2 = vcmp.gt.f32.partialorder %v178_v30, 0.0  ;;  %v169_v34 = vpop.f32.mrb[3].mxu0 }
 0x13c   :  { %v181_v35 = vsel %vm179_vm2, %v178_v30, %v180_v33 }
 0x13d   :  { %v182_v36 = vadd.f32 %v181_v35, %v166_v31 }
 0x13f   :  { %v183_v37 = vpack.c.bf16 %v182_v36, %v182_v36 }
 0x141   :  { %655 = vmatmul.mubr.bf16.vlgmr.msra.gmra.mrb[0].mxu1 %v183_v37 }
 0x142   :  { %674 = vmatprep.mubr.msk.bf16.mxu1 %vm888_vm1, %v887_v1  ;;  %659 = vmatpush3.bf16.msra.mxu1 %v729_v42 }
 0x143   :  { %660 = vmatprep.subr.bf16.mxu1 %v887_v1 }
 0x146   :  { %661 = vmatpush3.bf16.msra.mxu1 %v730_v43 }
 0x147   :  { %662 = vmatprep.subr.bf16.mxu1 %v887_v1 }
 0x14a   :  { %663 = vmatpush3.bf16.msra.mxu1 %v731_v44 }
 0x14b   :  { %664 = vmatprep.subr.bf16.mxu1 %v887_v1 }
 0x14e   :  { %665 = vmatpush3.bf16.msra.mxu1 %v732_v45 }
 0x14f   :  { %666 = vmatprep.subr.bf16.mxu1 %v887_v1 }
 0x152   :  { %667 = vmatpush3.bf16.msra.mxu1 %v733_v46 }
 0x153   :  { %668 = vmatprep.subr.bf16.mxu1 %v887_v1 }
 0x156   :  { %669 = vmatpush3.bf16.msra.mxu1 %v734_v47 }
 0x157   :  { %670 = vmatprep.subr.bf16.mxu1 %v887_v1 }
 0x15a   :  { %671 = vmatpush3.bf16.msra.mxu1 %v735_v58 }
 0x15b   :  { %672 = vmatprep.subr.bf16.mxu1 %v887_v1  ;;  %v611_v1 = vld [vmem:[%s1052_s8] ss:$0 sm:$0xff] }
 0x15e   :  { %673 = vmatpush3.bf16.msra.mxu1 %v736_v59 }
 0x214   :  { %v289_v49 = vpop.f32.mrb[0].mxu1 }
 0x215   :  { %v290_v50 = vadd.f32 %v585_v48, %v289_v49  ;;  %v656_v51 = vpop.f32.mrb[1].mxu1 }
 0x216   :  { %v292_v52 = vpop.f32.mrb[2].mxu1 }
 0x217   :  { %vm295_vm3 = vcmp.gt.f32.partialorder %v290_v50, 0.0  ;;  %v296_v53 = vmul.f32 0.01, %v290_v50  ;;  %v657_v54 = vpop.f32.mrb[3].mxu1 }
 0x219   :  { %v297_v55 = vsel %vm295_vm3, %v290_v50, %v296_v53 }
 0x21a   :  { %v298_v56 = vadd.f32 %v297_v55, %v182_v36 }
 0x21c   :  { %v299_v57 = vpack.c.bf16 %v298_v56, %v298_v56 }
 0x21e   :  { %429 = vmatmul.mubr.bf16.vlgmr.msra.gmra.mrb[4].mxu0 %v299_v57 }
 0x2f1   :  { %v430_v61 = vpop.f32.mrb[4].mxu0 }
 0x2f2   :  { %v444_v62 = vadd.f32 %v610_v60, %v430_v61  ;;  %v432_v63 = vpop.f32.mrb[5].mxu0 }
 0x2f3   :  { %v434_v0 = vpop.f32.mrb[6].mxu0 }
 0x2f4   :  { %v446_v2 = vmul.f32 0.01, %v444_v62  ;;  %vm445_vm4 = vcmp.gt.f32.partialorder %v444_v62, 0.0  ;;  %v435_v3 = vpop.f32.mrb[7].mxu0 }
 0x2f6   :  { %v447_v4 = vsel %vm445_vm4, %v444_v62, %v446_v2 }
 0x2f7   :  { %v448_v5 = vadd.f32 %v447_v4, %v432_v63 }
 0x2f9   :  { %v449_v6 = vpack.c.bf16 %v448_v5, %v448_v5 }
 0x2fb   :  { %675 = vmatmul.mubr.bf16.vlgmr.msra.gmra.mrb[4].mxu1 %v449_v6 }
 0x3ce   :  { %v555_v7 = vpop.f32.mrb[4].mxu1 }
 0x3cf   :  { %v556_v8 = vadd.f32 %v611_v1, %v555_v7  ;;  %v676_v9 = vpop.f32.mrb[5].mxu1 }
 0x3d0   :  { %v558_v10 = vpop.f32.mrb[6].mxu1 }
 0x3d1   :  { %561 = vst [vmem:[#allocation11] sm:$0xff] %v556_v8  ;;  %v677_v11 = vpop.f32.mrb[7].mxu1 }
 0x3d2   :  { %858 = shalt.err (!%p855_p2)
}
 0x3d3   :  { %s859_s8 = scalar_lea.hbm %s1053_s9, 128 }
 0x3d4   :  { %p860_p3 = scmp.ne.s32.totalorder %s1053_s9, %s859_s8  ;;  %p863_p4 = scmp.lt.u32.totalorder %s859_s8, %s1053_s9 }
 0x3d6   :  { %p865_p5 = pnand %p863_p4, %p860_p3 }
 0x3d8   :  { %868 = shalt.err (!%p865_p5)
}
 0x3d9   :  { %571 = dma.vmem_to_hbm [thread:$0]  %s569_s12, 128, %s1053_s9, [#allocation4]  }
 0x3da   :  { %875 = dma.done.wait [#allocation4], 128  }
 0x3db   :  { %876 = vsyncadd [#allocation4], 4294967168 }
 0x3dc   :  { %575 = vsyncpa [#allocation3], 1 }
 0x3dd   :  { %576 = vsyncpa [#allocation6], 1 }
 0x3de   :  { %577 = vsyncpa [#allocation9], 1 }
 0x3df   :  { %578 = vsyncpa [#allocation4], 1 }

// kernel: tpu_custom_call.1
= control target key start
LH: loop header
LB: loop body
LE: loop exit
PB: predicated region body
PF: predicated region fallthrough
CT: control target
= control target key end

     0   :  { %14 = vsyncpa [#allocation3], 0  ;;  %s1044_s0 = inlined_call_operand.hbm [shape: f32[8,32], index: 0, kind: input, shape index: {}]   ;;  %s1045_s1 = inlined_call_operand.hbm [shape: bf16[32,256], index: 1, kind: input, shape index: {}]   ;;  %s1046_s2 = inlined_call_operand.vmem [shape: f32[1,128], index: 2, kind: input, shape index: {}]   ;;  %s1047_s3 = inlined_call_operand.hbm [shape: bf16[128,128], index: 3, kind: input, shape index: {}]   ;;  %s1048_s4 = inlined_call_operand.vmem [shape: f32[1,128], index: 4, kind: input, shape index: {}]   ;;  %s1049_s5 = inlined_call_operand.hbm [shape: bf16[128,256], index: 5, kind: input, shape index: {}]   ;;  %s1050_s6 = inlined_call_operand.vmem [shape: f32[1,128], index: 6, kind: input, shape index: {}]   ;;  %s1051_s7 = inlined_call_operand.hbm [shape: bf16[128,128], index: 7, kind: input, shape index: {}]   ;;  %s1052_s8 = inlined_call_operand.vmem [shape: f32[1,128], index: 8, kind: input, shape index: {}]   ;;  %s1053_s9 = inlined_call_operand.hbm [shape: f32[8,128], index: 9, kind: output, shape index: {}]  }
   0x1   :  { %15 = vsyncpa [#allocation6], 0 }
   0x2   :  { %16 = vsyncpa [#allocation9], 0 }
   0x3   :  { %17 = vsyncpa [#allocation4], 0  ;;  %s877_s30 = smov [#allocation5]   ;;  %s737_s13 = scalar_lea.hbm %s1045_s1, 512 }
   0x4   :  { %s33_s10 = sshll.u32 %s877_s30, 4  ;;  %p738_p0 = scmp.ne.s32.totalorder %s1045_s1, %s737_s13  ;;  %s34_s10 = int_to_ptr.vmem [resolvable:$true] %s33_s10 }
   0x5   :  { %p741_p1 = scmp.lt.u32.totalorder %s737_s13, %s1045_s1 }
   0x7   :  { %p743_p2 = pnand %p741_p1, %p738_p0 }
   0x9   :  { %746 = shalt.err (!%p743_p2)
}
   0xa   :  { %s747_s18 = scalar_lea.vmem %s34_s10, 512  ;;  %p752_p4 = scmp.lt.s32.totalorder %s34_s10, %s34_s10 }
   0xb   :  { %p748_p3 = scmp.ne.s32.totalorder %s34_s10, %s747_s18  ;;  %p753_p5 = scmp.lt.s32.totalorder %s747_s18, %s747_s18 }
   0xd   :  { %p754_p6 = por %p753_p5, %p752_p4 }
   0xf   :  { %p755_p7 = pnand %p754_p6, %p748_p3 }
  0x11   :  { %758 = shalt.err (!%p755_p7)
}
  0x12   :  { %s878_s19 = smov 128   ;;  %s879_s20 = smov 8  }
  0x13   :  { %39 = dma.hbm_to_vmem [thread:$0]  %s1045_s1, 512, %s34_s10, [#allocation6], %s878_s19, %s878_s19, %s879_s20  }
  0x14   :  { %s880_s23 = smov [#allocation8]   ;;  %s881_s25 = smov [#allocation2]  }
  0x15   :  { %s61_s24 = sshll.u32 %s880_s23, 4  ;;  %s24_s26 = sshll.u32 %s881_s25, 4  ;;  %s62_s24 = int_to_ptr.vmem [resolvable:$true] %s61_s24  ;;  %s25_s26 = int_to_ptr.vmem [resolvable:$true] %s24_s26 }
  0x16   :  { %s759_s29 = scalar_lea.hbm %s1049_s5, 2048 }
  0x17   :  { %p760_p8 = scmp.ne.s32.totalorder %s1049_s5, %s759_s29  ;;  %p763_p9 = scmp.lt.u32.totalorder %s759_s29, %s1049_s5 }
  0x19   :  { %p765_p10 = pnand %p763_p9, %p760_p8 }
  0x1b   :  { %768 = shalt.err (!%p765_p10)
}
  0x1c   :  { %s769_s1 = scalar_lea.vmem %s62_s24, 2048  ;;  %p774_p12 = scmp.lt.s32.totalorder %s62_s24, %s62_s24 }
  0x1d   :  { %p770_p11 = scmp.ne.s32.totalorder %s62_s24, %s769_s1  ;;  %p775_p13 = scmp.lt.s32.totalorder %s769_s1, %s769_s1 }
  0x1f   :  { %p776_p0 = por %p775_p13, %p774_p12 }
  0x21   :  { %p777_p1 = pnand %p776_p0, %p770_p11 }
  0x23   :  { %780 = shalt.err (!%p777_p1)
}
  0x24   :  { %67 = dma.hbm_to_vmem [thread:$0]  %s1049_s5, 2048, %s62_s24, [#allocation9], %s878_s19, %s878_s19, %s879_s20  }
  0x25   :  { %s781_s17 = scalar_lea.hbm %s1044_s0, 128 }
  0x26   :  { %p782_p2 = scmp.ne.s32.totalorder %s1044_s0, %s781_s17  ;;  %p785_p3 = scmp.lt.u32.totalorder %s781_s17, %s1044_s0 }
  0x28   :  { %p787_p4 = pnand %p785_p3, %p782_p2 }
  0x2a   :  { %790 = shalt.err (!%p787_p4)
}
  0x2b   :  { %s791_s25 = scalar_lea.vmem %s25_s26, 128  ;;  %p796_p6 = scmp.lt.s32.totalorder %s25_s26, %s25_s26 }
  0x2c   :  { %p792_p5 = scmp.ne.s32.totalorder %s25_s26, %s791_s25  ;;  %p797_p7 = scmp.lt.s32.totalorder %s791_s25, %s791_s25 }
  0x2e   :  { %p798_p8 = por %p797_p7, %p796_p6 }
  0x30   :  { %p799_p9 = pnand %p798_p8, %p792_p5 }
  0x32   :  { %802 = shalt.err (!%p799_p9)
}
  0x33   :  { %27 = dma.hbm_to_vmem [thread:$0]  %s1044_s0, 128, %s25_s26, [#allocation3]  }
  0x34   :  { %s882_s20 = smov [#allocation7]   ;;  %s803_s29 = scalar_lea.hbm %s1047_s3, 1024 }
  0x35   :  { %s47_s24 = sshll.u32 %s882_s20, 4  ;;  %p804_p10 = scmp.ne.s32.totalorder %s1047_s3, %s803_s29  ;;  %s48_s24 = int_to_ptr.vmem [resolvable:$true] %s47_s24 }
  0x36   :  { %p807_p11 = scmp.lt.u32.totalorder %s803_s29, %s1047_s3 }
  0x38   :  { %p809_p12 = pnand %p807_p11, %p804_p10 }
  0x3a   :  { %812 = shalt.err (!%p809_p12)
}
  0x3b   :  { %s813_s1 = scalar_lea.vmem %s48_s24, 1024  ;;  %p818_p0 = scmp.lt.s32.totalorder %s48_s24, %s48_s24 }
  0x3c   :  { %p814_p13 = scmp.ne.s32.totalorder %s48_s24, %s813_s1  ;;  %p819_p1 = scmp.lt.s32.totalorder %s813_s1, %s813_s1 }
  0x3e   :  { %p820_p2 = por %p819_p1, %p818_p0 }
  0x40   :  { %p821_p3 = pnand %p820_p2, %p814_p13 }
  0x42   :  { %824 = shalt.err (!%p821_p3)
}
  0x43   :  { %s883_s0 = smov 64   ;;  %s884_s26 = smov 4  }
  0x44   :  { %53 = dma.hbm_to_vmem [thread:$0]  %s1047_s3, 1024, %s48_s24, [#allocation6], %s883_s0, %s883_s0, %s884_s26  }
  0x45   :  { %s885_s15 = smov [#allocation10]   ;;  %s825_s21 = scalar_lea.hbm %s1051_s7, 1024 }
  0x46   :  { %s75_s16 = sshll.u32 %s885_s15, 4  ;;  %p826_p4 = scmp.ne.s32.totalorder %s1051_s7, %s825_s21  ;;  %s76_s16 = int_to_ptr.vmem [resolvable:$true] %s75_s16 }
  0x47   :  { %p829_p5 = scmp.lt.u32.totalorder %s825_s21, %s1051_s7 }
  0x49   :  { %p831_p6 = pnand %p829_p5, %p826_p4 }
  0x4b   :  { %834 = shalt.err (!%p831_p6)
}
  0x4c   :  { %s835_s19 = scalar_lea.vmem %s76_s16, 1024  ;;  %p840_p8 = scmp.lt.s32.totalorder %s76_s16, %s76_s16 }
  0x4d   :  { %p836_p7 = scmp.ne.s32.totalorder %s76_s16, %s835_s19  ;;  %p841_p9 = scmp.lt.s32.totalorder %s835_s19, %s835_s19 }
  0x4f   :  { %p842_p10 = por %p841_p9, %p840_p8 }
  0x51   :  { %p843_p11 = pnand %p842_p10, %p836_p7 }
  0x53   :  { %846 = shalt.err (!%p843_p11)
}
  0x54   :  { %81 = dma.hbm_to_vmem [thread:$0]  %s1051_s7, 1024, %s76_s16, [#allocation9], %s883_s0, %s883_s0, %s884_s26  }
  0x55   :  { %869 = dma.done.wait [#allocation3], 128  }
  0x56   :  { %870 = vsyncadd [#allocation3], 4294967168 }
  0x57   :  { %871 = dma.done.wait [#allocation6], 1536  }
  0x58   :  { %872 = vsyncadd [#allocation6], 4294965760 }
  0x59   :  { %873 = dma.done.wait [#allocation9], 3072  }
  0x5a   :  { %874 = vsyncadd [#allocation9], 4294964224  ;;  %v886_v0 = vmov 0   ;;  %v887_v1 = vmov 0.0   ;;  %v691_v2 = vld [vmem:[#allocation5 + $0x4] ss:$8 sps:$4 sm:$0xff]  }
  0x5b   :  { %162 = vmatprep.mubr.bf16.mxu0 %v886_v0  ;;  %638 = vmatprep.subr.bf16.mxu1 %v887_v1  ;;  %v693_v3 = vld [vmem:[#allocation5] ss:$8 sps:$4 sm:$0xff]   ;;  %v694_v4 = vld [vmem:[#allocation5 + $0x14] ss:$8 sps:$4 sm:$0xff]   ;;  %v696_v5 = vld [vmem:[#allocation5 + $0x10] ss:$8 sps:$4 sm:$0xff]  }
  0x5c   :  { %130 = vmatprep.subr.bf16.mxu0 %v691_v2  ;;  %v100_v6 = vld [vmem:[#allocation2] sm:$0xff]  ;;  %v697_v7 = vld [vmem:[#allocation7] sm:$0xff]   ;;  %v698_v8 = vld [vmem:[#allocation7 + $0x8] sm:$0xff]   ;;  %vm126_vm0 = vcmask 261120   ;;  %vm888_vm1 = vmmov 0   ;;  %s889_s11 = smov [#allocation11]  }
  0x5d   :  { %131 = vmatpush1.bf16.msra.mxu0 %v693_v3  ;;  %639 = vmatpush3.bf16.msra.mxu1 %v697_v7  ;;  %v101_v9 = vpack.c.bf16 %v100_v6, %v100_v6  ;;  %v699_v10 = vld [vmem:[#allocation7 + $0x10] sm:$0xff]   ;;  %v700_v11 = vld [vmem:[#allocation7 + $0x18] sm:$0xff]   ;;  %v701_v12 = vld [vmem:[#allocation7 + $0x20] sm:$0xff]   ;;  %s568_s12 = sshll.u32 %s889_s11, 4  ;;  %s569_s12 = int_to_ptr.vmem [resolvable:$true] %s568_s12 }
  0x5e   :  { %132 = vmatprep.subr.bf16.mxu0 %v694_v4  ;;  %640 = vmatprep.subr.bf16.mxu1 %v887_v1  ;;  %v702_v13 = vld [vmem:[#allocation7 + $0x28] sm:$0xff]   ;;  %v703_v14 = vld [vmem:[#allocation7 + $0x30] sm:$0xff]   ;;  %v704_v15 = vld [vmem:[#allocation7 + $0x38] sm:$0xff]   ;;  %p852_p13 = scmp.lt.s32.totalorder %s569_s12, %s569_s12 }
  0x5f   :  { %654 = vmatprep.mubr.msk.bf16.mxu1 %vm888_vm1, %v887_v1  ;;  %v705_v16 = vld [vmem:[#allocation8] ss:$8 sps:$4 sm:$0xff]   ;;  %v707_v17 = vld [vmem:[#allocation8 + $0x4] ss:$8 sps:$4 sm:$0xff]   ;;  %v710_v18 = vld [vmem:[#allocation8 + $0x14] ss:$8 sps:$4 sm:$0xff]  }
  0x60   :  { %v708_v19 = vld [vmem:[#allocation8 + $0x10] ss:$8 sps:$4 sm:$0xff]   ;;  %v713_v20 = vld [vmem:[#allocation8 + $0x24] ss:$8 sps:$4 sm:$0xff]   ;;  %v711_v21 = vld [vmem:[#allocation8 + $0x20] ss:$8 sps:$4 sm:$0xff]  }
  0x61   :  { %133 = vmatpush1.bf16.msra.mxu0 %v696_v5  ;;  %641 = vmatpush3.bf16.msra.mxu1 %v698_v8  ;;  %v716_v22 = vld [vmem:[#allocation8 + $0x34] ss:$8 sps:$4 sm:$0xff]   ;;  %v714_v23 = vld [vmem:[#allocation8 + $0x30] ss:$8 sps:$4 sm:$0xff]   ;;  %v719_v24 = vld [vmem:[#allocation8 + $0x44] ss:$8 sps:$4 sm:$0xff]  }
  0x62   :  { %642 = vmatprep.subr.bf16.mxu1 %v887_v1  ;;  %396 = vmatprep.subr.bf16.mxu0 %v707_v17  ;;  %v717_v25 = vld [vmem:[#allocation8 + $0x40] ss:$8 sps:$4 sm:$0xff]   ;;  %v722_v26 = vld [vmem:[#allocation8 + $0x54] ss:$8 sps:$4 sm:$0xff]   ;;  %v720_v27 = vld [vmem:[#allocation8 + $0x50] ss:$8 sps:$4 sm:$0xff]  }
  0x63   :  { %v584_v28 = vld [vmem:[%s1046_s2] ss:$0 sm:$0xff]  ;;  %v725_v38 = vld [vmem:[#allocation8 + $0x64] ss:$8 sps:$4 sm:$0xff]   ;;  %v723_v39 = vld [vmem:[#allocation8 + $0x60] ss:$8 sps:$4 sm:$0xff]  }
  0x64   :  { %583 = vmatmul.mubr.msk.bf16.vlgmr.msra.gmra.mrb[0].mxu0 %vm126_vm0, %v101_v9  ;;  %v728_v40 = vld [vmem:[#allocation8 + $0x74] ss:$8 sps:$4 sm:$0xff]   ;;  %v726_v41 = vld [vmem:[#allocation8 + $0x70] ss:$8 sps:$4 sm:$0xff]   ;;  %v729_v42 = vld [vmem:[#allocation10] sm:$0xff]  }
  0x65   :  { %428 = vmatprep.mubr.bf16.mxu0 %v886_v0  ;;  %643 = vmatpush3.bf16.msra.mxu1 %v699_v10  ;;  %v730_v43 = vld [vmem:[#allocation10 + $0x8] sm:$0xff]   ;;  %v731_v44 = vld [vmem:[#allocation10 + $0x10] sm:$0xff]   ;;  %v732_v45 = vld [vmem:[#allocation10 + $0x18] sm:$0xff]  }
  0x66   :  { %644 = vmatprep.subr.bf16.mxu1 %v887_v1  ;;  %397 = vmatpush1.bf16.msra.mxu0 %v705_v16  ;;  %v733_v46 = vld [vmem:[#allocation10 + $0x20] sm:$0xff]   ;;  %v734_v47 = vld [vmem:[#allocation10 + $0x28] sm:$0xff]   ;;  %v585_v48 = vld [vmem:[%s1048_s4] ss:$0 sm:$0xff] }
  0x67   :  { %398 = vmatprep.subr.bf16.mxu0 %v710_v18  ;;  %v735_v58 = vld [vmem:[#allocation10 + $0x30] sm:$0xff]   ;;  %v736_v59 = vld [vmem:[#allocation10 + $0x38] sm:$0xff]  }
  0x68   :  { %v610_v60 = vld [vmem:[%s1050_s6] ss:$0 sm:$0xff]  ;;  %s847_s6 = scalar_lea.vmem %s569_s12, 128 }
  0x69   :  { %645 = vmatpush3.bf16.msra.mxu1 %v700_v11  ;;  %p848_p12 = scmp.ne.s32.totalorder %s569_s12, %s847_s6  ;;  %p853_p0 = scmp.lt.s32.totalorder %s847_s6, %s847_s6 }
  0x6a   :  { %646 = vmatprep.subr.bf16.mxu1 %v887_v1  ;;  %399 = vmatpush1.bf16.msra.mxu0 %v708_v19 }
  0x6b   :  { %400 = vmatprep.subr.bf16.mxu0 %v713_v20  ;;  %p854_p1 = por %p853_p0, %p852_p13 }
  0x6d   :  { %647 = vmatpush3.bf16.msra.mxu1 %v701_v12  ;;  %p855_p2 = pnand %p854_p1, %p848_p12 }
  0x6e   :  { %648 = vmatprep.subr.bf16.mxu1 %v887_v1  ;;  %401 = vmatpush1.bf16.msra.mxu0 %v711_v21 }
  0x6f   :  { %402 = vmatprep.subr.bf16.mxu0 %v716_v22 }
  0x71   :  { %649 = vmatpush3.bf16.msra.mxu1 %v702_v13 }
  0x72   :  { %650 = vmatprep.subr.bf16.mxu1 %v887_v1  ;;  %403 = vmatpush1.bf16.msra.mxu0 %v714_v23 }
  0x73   :  { %404 = vmatprep.subr.bf16.mxu0 %v719_v24 }
  0x75   :  { %651 = vmatpush3.bf16.msra.mxu1 %v703_v14 }
  0x76   :  { %652 = vmatprep.subr.bf16.mxu1 %v887_v1  ;;  %405 = vmatpush1.bf16.msra.mxu0 %v717_v25 }
  0x77   :  { %406 = vmatprep.subr.bf16.mxu0 %v722_v26 }
  0x79   :  { %653 = vmatpush3.bf16.msra.mxu1 %v704_v15 }
  0x7a   :  { %658 = vmatprep.subr.bf16.mxu1 %v887_v1  ;;  %407 = vmatpush1.bf16.msra.mxu0 %v720_v27 }
  0x7b   :  { %408 = vmatprep.subr.bf16.mxu0 %v725_v38 }
  0x7e   :  { %409 = vmatpush1.bf16.msra.mxu0 %v723_v39 }
  0x7f   :  { %410 = vmatprep.subr.bf16.mxu0 %v728_v40 }
  0x82   :  { %411 = vmatpush1.bf16.msra.mxu0 %v726_v41 }
 0x137   :  { %v164_v29 = vpop.f32.mrb[0].mxu0 }
 0x138   :  { %v178_v30 = vadd.f32 %v584_v28, %v164_v29  ;;  %v166_v31 = vpop.f32.mrb[1].mxu0 }
 0x139   :  { %v168_v32 = vpop.f32.mrb[2].mxu0 }
 0x13a   :  { %v180_v33 = vmul.f32 0.01, %v178_v30  ;;  %vm179_vm2 = vcmp.gt.f32.partialorder %v178_v30, 0.0  ;;  %v169_v34 = vpop.f32.mrb[3].mxu0 }
 0x13c   :  { %v181_v35 = vsel %vm179_vm2, %v178_v30, %v180_v33 }
 0x13d   :  { %v182_v36 = vadd.f32 %v181_v35, %v166_v31 }
 0x13f   :  { %v183_v37 = vpack.c.bf16 %v182_v36, %v182_v36 }
 0x141   :  { %655 = vmatmul.mubr.bf16.vlgmr.msra.gmra.mrb[0].mxu1 %v183_v37 }
 0x142   :  { %674 = vmatprep.mubr.msk.bf16.mxu1 %vm888_vm1, %v887_v1  ;;  %659 = vmatpush3.bf16.msra.mxu1 %v729_v42 }
 0x143   :  { %660 = vmatprep.subr.bf16.mxu1 %v887_v1 }
 0x146   :  { %661 = vmatpush3.bf16.msra.mxu1 %v730_v43 }
 0x147   :  { %662 = vmatprep.subr.bf16.mxu1 %v887_v1 }
 0x14a   :  { %663 = vmatpush3.bf16.msra.mxu1 %v731_v44 }
 0x14b   :  { %664 = vmatprep.subr.bf16.mxu1 %v887_v1 }
 0x14e   :  { %665 = vmatpush3.bf16.msra.mxu1 %v732_v45 }
 0x14f   :  { %666 = vmatprep.subr.bf16.mxu1 %v887_v1 }
 0x152   :  { %667 = vmatpush3.bf16.msra.mxu1 %v733_v46 }
 0x153   :  { %668 = vmatprep.subr.bf16.mxu1 %v887_v1 }
 0x156   :  { %669 = vmatpush3.bf16.msra.mxu1 %v734_v47 }
 0x157   :  { %670 = vmatprep.subr.bf16.mxu1 %v887_v1 }
 0x15a   :  { %671 = vmatpush3.bf16.msra.mxu1 %v735_v58 }
 0x15b   :  { %672 = vmatprep.subr.bf16.mxu1 %v887_v1  ;;  %v611_v1 = vld [vmem:[%s1052_s8] ss:$0 sm:$0xff] }
 0x15e   :  { %673 = vmatpush3.bf16.msra.mxu1 %v736_v59 }
 0x214   :  { %v289_v49 = vpop.f32.mrb[0].mxu1 }
 0x215   :  { %v290_v50 = vadd.f32 %v585_v48, %v289_v49  ;;  %v656_v51 = vpop.f32.mrb[1].mxu1 }
 0x216   :  { %v292_v52 = vpop.f32.mrb[2].mxu1 }
 0x217   :  { %vm295_vm3 = vcmp.gt.f32.partialorder %v290_v50, 0.0  ;;  %v296_v53 = vmul.f32 0.01, %v290_v50  ;;  %v657_v54 = vpop.f32.mrb[3].mxu1 }
 0x219   :  { %v297_v55 = vsel %vm295_vm3, %v290_v50, %v296_v53 }
 0x21a   :  { %v298_v56 = vadd.f32 %v297_v55, %v182_v36 }
 0x21c   :  { %v299_v57 = vpack.c.bf16 %v298_v56, %v298_v56 }
 0x21e   :  { %429 = vmatmul.mubr.bf16.vlgmr.msra.gmra.mrb[4].mxu0 %v299_v57 }
 0x2f1   :  { %v430_v61 = vpop.f32.mrb[4].mxu0 }
 0x2f2   :  { %v444_v62 = vadd.f32 %v610_v60, %v430_v61  ;;  %v432_v63 = vpop.f32.mrb[5].mxu0 }
 0x2f3   :  { %v434_v0 = vpop.f32.mrb[6].mxu0 }
 0x2f4   :  { %v446_v2 = vmul.f32 0.01, %v444_v62  ;;  %vm445_vm4 = vcmp.gt.f32.partialorder %v444_v62, 0.0  ;;  %v435_v3 = vpop.f32.mrb[7].mxu0 }
 0x2f6   :  { %v447_v4 = vsel %vm445_vm4, %v444_v62, %v446_v2 }
 0x2f7   :  { %v448_v5 = vadd.f32 %v447_v4, %v432_v63 }
 0x2f9   :  { %v449_v6 = vpack.c.bf16 %v448_v5, %v448_v5 }
 0x2fb   :  { %675 = vmatmul.mubr.bf16.vlgmr.msra.gmra.mrb[4].mxu1 %v449_v6 }
 0x3ce   :  { %v555_v7 = vpop.f32.mrb[4].mxu1 }
 0x3cf   :  { %v556_v8 = vadd.f32 %v611_v1, %v555_v7  ;;  %v676_v9 = vpop.f32.mrb[5].mxu1 }
 0x3d0   :  { %v558_v10 = vpop.f32.mrb[6].mxu1 }
 0x3d1   :  { %561 = vst [vmem:[#allocation11] sm:$0xff] %v556_v8  ;;  %v677_v11 = vpop.f32.mrb[7].mxu1 }
 0x3d2   :  { %858 = shalt.err (!%p855_p2)
}
 0x3d3   :  { %s859_s8 = scalar_lea.hbm %s1053_s9, 128 }
 0x3d4   :  { %p860_p3 = scmp.ne.s32.totalorder %s1053_s9, %s859_s8  ;;  %p863_p4 = scmp.lt.u32.totalorder %s859_s8, %s1053_s9 }
 0x3d6   :  { %p865_p5 = pnand %p863_p4, %p860_p3 }
 0x3d8   :  { %868 = shalt.err (!%p865_p5)
}
 0x3d9   :  { %571 = dma.vmem_to_hbm [thread:$0]  %s569_s12, 128, %s1053_s9, [#allocation4]  }
 0x3da   :  { %875 = dma.done.wait [#allocation4], 128  }
 0x3db   :  { %876 = vsyncadd [#allocation4], 4294967168 }
 0x3dc   :  { %575 = vsyncpa [#allocation3], 1 }
 0x3dd   :  { %576 = vsyncpa [#allocation6], 1 }
 0x3de   :  { %577 = vsyncpa [#allocation9], 1 }
 0x3df   :  { %578 = vsyncpa [#allocation4], 1 }

</bundles_post_ra>
